<compile_context>
chip_gen: v5e
topology: v5e:2x2
jax: 0.10.0
libtpu: 0.0.40
codegen_flags: <defaults>
</compile_context>

<pallas_src>
import jax
import jax.numpy as jnp
from jax.experimental import pallas as pl
from jax.experimental.pallas import tpu as pltpu

LOG_STD_MIN = -20.0
LOG_STD_MAX = 2.0

_MAX_BATCH_TILE = 2048  # rows; see VMEM reasoning above.


def _round_up(x, m):
    return ((x + m - 1) // m) * m


def _actor_cql_kernel(s_ref,
                      w1_ref, b1_ref,
                      w2_ref, b2_ref,
                      w3_ref, b3_ref,
                      wh_ref, bh_ref,
                      mu_ref, ls_ref):
    """Fused MLP: fc1->relu->fc2->relu->fc3->relu->[mu | clamp(log_std)].

    Head weights are pre-concatenated to (H, 2A); columns [0, A) are mu and
    [A, 2A) are log_std (clamped before store).
    """
    x = s_ref[...]

    h = jnp.maximum(
        jnp.dot(x, w1_ref[...], preferred_element_type=jnp.float32) + b1_ref[...], 0.0)
    h = jnp.maximum(
        jnp.dot(h, w2_ref[...], preferred_element_type=jnp.float32) + b2_ref[...], 0.0)
    h = jnp.maximum(
        jnp.dot(h, w3_ref[...], preferred_element_type=jnp.float32) + b3_ref[...], 0.0)

    heads = jnp.dot(h, wh_ref[...], preferred_element_type=jnp.float32) + bh_ref[...]

    a = mu_ref.shape[-1]  # static action size
    mu_ref[...] = heads[:, :a].astype(mu_ref.dtype)
    ls_ref[...] = jnp.clip(heads[:, a:], LOG_STD_MIN, LOG_STD_MAX).astype(ls_ref.dtype)


def prepare_params(params):
    """One-time conversion from PyTorch layout to kernel layout.

    Call ONCE after init / after loading weights, NOT per forward call.
    Weights become (in, out); biases become (1, out); the mu / log_std heads
    are fused into a single (H, 2A) weight and (1, 2A) bias.
    """
    return {
        "w1": jnp.asarray(params["fc1_w"]).T,
        "b1": jnp.asarray(params["fc1_b"])[None, :],
        "w2": jnp.asarray(params["fc2_w"]).T,
        "b2": jnp.asarray(params["fc2_b"])[None, :],
        "w3": jnp.asarray(params["fc3_w"]).T,
        "b3": jnp.asarray(params["fc3_b"])[None, :],
        "wh": jnp.concatenate(
            [jnp.asarray(params["mu_w"]).T, jnp.asarray(params["ls_w"]).T], axis=1),
        "bh": jnp.concatenate(
            [jnp.asarray(params["mu_b"]), jnp.asarray(params["ls_b"])])[None, :],
    }


@jax.jit
def actor_cql_forward(state, kp):
    """Fused forward. `state`: (B, S) f32, `kp`: output of prepare_params().

    Returns (mu, log_std), each (B, A) f32.
    """
    B, S = state.shape
    H = kp["w1"].shape[1]
    H2 = kp["w2"].shape[1]
    A2 = kp["wh"].shape[1]
    A = A2 // 2

    # Batch tile: multiple of 8 sublanes, capped (lane-padded VMEM budget).
    TB = min(_MAX_BATCH_TILE, _round_up(B, 8))
    padded_B = _round_up(B, TB)
    if padded_B != B:
        state = jnp.pad(state, ((0, padded_B - B), (0, 0)))

    grid = (padded_B // TB,)

    # Weights / biases: full-array blocks, index_map pinned to (0, 0) so they
    # are loaded once and stay VMEM-resident across all grid steps.
    resident = lambda shape: pl.BlockSpec(shape, lambda i: (0, 0))

    weight_bytes = 4 * (S * H + H + H * H2 + H2 + H2 * H + H + H * A2 + A2)
    cost = pl.CostEstimate(
        flops=2 * padded_B * (S * H + H * H2 + H2 * H + H * A2),
        transcendentals=0,
        bytes_accessed=4 * padded_B * (S + A2) + weight_bytes,
    )

    mu, log_std = pl.pallas_call(
        _actor_cql_kernel,
        out_shape=(
            jax.ShapeDtypeStruct((padded_B, A), jnp.float32),
            jax.ShapeDtypeStruct((padded_B, A), jnp.float32),
        ),
        grid_spec=pltpu.PrefetchScalarGridSpec(
            num_scalar_prefetch=0,
            grid=grid,
            in_specs=[
                pl.BlockSpec((TB, S), lambda i: (i, 0)),   # state (pipelined)
                resident((S, H)), resident((1, H)),        # fc1
                resident((H, H2)), resident((1, H2)),      # fc2
                resident((H2, H)), resident((1, H)),       # fc3
                resident((H, A2)), resident((1, A2)),      # fused heads
            ],
            out_specs=[
                pl.BlockSpec((TB, A), lambda i: (i, 0)),   # mu
                pl.BlockSpec((TB, A), lambda i: (i, 0)),   # log_std (clamped)
            ],
        ),
        compiler_params=pltpu.CompilerParams(
            dimension_semantics=("parallel",)),
        cost_estimate=cost,
    )(state, kp["w1"], kp["b1"], kp["w2"], kp["b2"],
      kp["w3"], kp["b3"], kp["wh"], kp["bh"])

    return mu[:B], log_std[:B]


def init_params(key, state_size, action_size, hidden_size=32, hidden_size2=32,
                init_w=0.003):
    """Deterministic parameter init mirroring Actor_CQL.reset_parameters().

    Note: hidden_init() in the reference uses weight.size()[0] (= fan_out for
    nn.Linear); we reproduce that exactly. Biases keep PyTorch's default
    uniform(-1/sqrt(fan_in), 1/sqrt(fan_in)).
    """
    ks = jax.random.split(key, 10)

    def uni(k, shape, lim):
        return jax.random.uniform(k, shape, jnp.float32, -lim, lim)

    params = {}
    # fc1: weight (H, S)
    params["fc1_w"] = uni(ks[0], (hidden_size, state_size), 1.0 / jnp.sqrt(hidden_size))
    params["fc1_b"] = uni(ks[1], (hidden_size,), 1.0 / jnp.sqrt(state_size))
    # fc2: weight (H2, H)
    params["fc2_w"] = uni(ks[2], (hidden_size2, hidden_size), 1.0 / jnp.sqrt(hidden_size2))
    params["fc2_b"] = uni(ks[3], (hidden_size2,), 1.0 / jnp.sqrt(hidden_size))
    # fc3: weight (H, H2)
    params["fc3_w"] = uni(ks[4], (hidden_size, hidden_size2), 1.0 / jnp.sqrt(hidden_size))
    params["fc3_b"] = uni(ks[5], (hidden_size,), 1.0 / jnp.sqrt(hidden_size2))
    # mu head: weight (A, H) uniform(-init_w, init_w)
    params["mu_w"] = uni(ks[6], (action_size, hidden_size), init_w)
    params["mu_b"] = uni(ks[7], (action_size,), 1.0 / jnp.sqrt(hidden_size))
    # log_std head: weight (A, H) uniform(-init_w, init_w)
    params["ls_w"] = uni(ks[8], (action_size, hidden_size), init_w)
    params["ls_b"] = uni(ks[9], (action_size,), 1.0 / jnp.sqrt(hidden_size))
    return params


def _reference_forward(state, params):
    """Pure-JAX reference matching the PyTorch forward()."""
    h = jax.nn.relu(state @ params["fc1_w"].T + params["fc1_b"])
    h = jax.nn.relu(h @ params["fc2_w"].T + params["fc2_b"])
    h = jax.nn.relu(h @ params["fc3_w"].T + params["fc3_b"])
    mu = h @ params["mu_w"].T + params["mu_b"]
    log_std = jnp.clip(h @ params["ls_w"].T + params["ls_b"], LOG_STD_MIN, LOG_STD_MAX)
    return mu, log_std


if __name__ == "__main__":
    key = jax.random.PRNGKey(0)
    k_param, k_state = jax.random.split(key)

    batch = 8
    state_size = 16
    action_size = 8
    hidden_size = 32
    hidden_size2 = 32

    params = init_params(k_param, state_size, action_size, hidden_size, hidden_size2)
    kparams = prepare_params(params)  # one-time layout conversion (outside jit path)
    state = jax.random.normal(k_state, (batch, state_size), dtype=jnp.float32)

    mu, log_std = actor_cql_forward(state, kparams)
    jax.block_until_ready((mu, log_std))

    mu_ref, log_std_ref = _reference_forward(state, params)
    assert mu.shape == (batch, action_size) and log_std.shape == (batch, action_size)
    assert jnp.allclose(mu, mu_ref, atol=1e-5, rtol=1e-5)
    assert jnp.allclose(log_std, log_std_ref, atol=1e-5, rtol=1e-5)

    # Also exercise a larger, non-tile-aligned batch to check grid + padding path.
    big_state = jax.random.normal(jax.random.PRNGKey(1), (1000, state_size), jnp.float32)
    mu_b, ls_b = actor_cql_forward(big_state, kparams)
    jax.block_until_ready((mu_b, ls_b))
    mu_br, ls_br = _reference_forward(big_state, params)
    assert jnp.allclose(mu_b, mu_br, atol=1e-5, rtol=1e-5)
    assert jnp.allclose(ls_b, ls_br, atol=1e-5, rtol=1e-5)

    # TODO(synk): evaluate()/select_action() (Normal rsample + tanh squash) are
    # distribution-level helpers outside forward(); implement at the JAX level.
    print("KERNEL_OK")
</pallas_src>

<mosaic_0001>
module attributes {stable_mosaic.version = 11 : i64} {
  func.func @_actor_cql_kernel(%arg0: i32, %arg1: memref<8x16xf32, #tpu.memory_space<vmem>>, %arg2: memref<16x32xf32, #tpu.memory_space<vmem>>, %arg3: memref<1x32xf32, #tpu.memory_space<vmem>>, %arg4: memref<32x32xf32, #tpu.memory_space<vmem>>, %arg5: memref<1x32xf32, #tpu.memory_space<vmem>>, %arg6: memref<32x32xf32, #tpu.memory_space<vmem>>, %arg7: memref<1x32xf32, #tpu.memory_space<vmem>>, %arg8: memref<32x16xf32, #tpu.memory_space<vmem>>, %arg9: memref<1x16xf32, #tpu.memory_space<vmem>>, %arg10: memref<8x8xf32, #tpu.memory_space<vmem>>, %arg11: memref<8x8xf32, #tpu.memory_space<vmem>>) attributes {dimension_semantics = [#tpu.dimension_semantics<parallel>], iteration_bounds = array<i64: 1>, scalar_prefetch = 0 : i64, scratch_operands = 0 : i64, tpu.core_type = #tpu.core_type<tc>, window_params = [{transform_indices = @transform_0, window_bounds = array<i64: 8, 16>}, {pipeline_mode = #tpu.pipeline_mode<synchronous>, transform_indices = @transform_1, window_bounds = array<i64: 16, 32>}, {pipeline_mode = #tpu.pipeline_mode<synchronous>, transform_indices = @transform_2, window_bounds = array<i64: 1, 32>}, {pipeline_mode = #tpu.pipeline_mode<synchronous>, transform_indices = @transform_3, window_bounds = array<i64: 32, 32>}, {pipeline_mode = #tpu.pipeline_mode<synchronous>, transform_indices = @transform_4, window_bounds = array<i64: 1, 32>}, {pipeline_mode = #tpu.pipeline_mode<synchronous>, transform_indices = @transform_5, window_bounds = array<i64: 32, 32>}, {pipeline_mode = #tpu.pipeline_mode<synchronous>, transform_indices = @transform_6, window_bounds = array<i64: 1, 32>}, {pipeline_mode = #tpu.pipeline_mode<synchronous>, transform_indices = @transform_7, window_bounds = array<i64: 32, 16>}, {pipeline_mode = #tpu.pipeline_mode<synchronous>, transform_indices = @transform_8, window_bounds = array<i64: 1, 16>}, {transform_indices = @transform_9, window_bounds = array<i64: 8, 8>}, {transform_indices = @transform_10, window_bounds = array<i64: 8, 8>}]} {
    %c0 = arith.constant 0 : index
    %c0_0 = arith.constant 0 : index
    %0 = vector.load %arg1[%c0, %c0_0] : memref<8x16xf32, #tpu.memory_space<vmem>>, vector<8x16xf32>
    %c0_1 = arith.constant 0 : index
    %c0_2 = arith.constant 0 : index
    %1 = vector.load %arg2[%c0_1, %c0_2] : memref<16x32xf32, #tpu.memory_space<vmem>>, vector<16x32xf32>
    %cst = arith.constant dense<0.000000e+00> : vector<8x32xf32>
    %2 = tpu.matmul %0, %1, %cst {dimension_numbers = #tpu.dot_dimension_numbers<[1], [0], [0], [1], [0, 0, 1, 1], [], []>} : vector<8x16xf32>, vector<16x32xf32>, vector<8x32xf32> -> vector<8x32xf32>
    %c0_3 = arith.constant 0 : index
    %c0_4 = arith.constant 0 : index
    %3 = vector.load %arg3[%c0_3, %c0_4] : memref<1x32xf32, #tpu.memory_space<vmem>>, vector<1x32xf32>
    %4 = vector.broadcast %3 : vector<1x32xf32> to vector<8x32xf32>
    %5 = arith.addf %2, %4 : vector<8x32xf32>
    %cst_5 = arith.constant 0.000000e+00 : f32
    %6 = vector.broadcast %cst_5 : f32 to vector<8x32xf32>
    %7 = arith.maximumf %5, %6 : vector<8x32xf32>
    %c0_6 = arith.constant 0 : index
    %c0_7 = arith.constant 0 : index
    %8 = vector.load %arg4[%c0_6, %c0_7] : memref<32x32xf32, #tpu.memory_space<vmem>>, vector<32x32xf32>
    %cst_8 = arith.constant dense<0.000000e+00> : vector<8x32xf32>
    %9 = tpu.matmul %7, %8, %cst_8 {dimension_numbers = #tpu.dot_dimension_numbers<[1], [0], [0], [1], [0, 0, 1, 1], [], []>} : vector<8x32xf32>, vector<32x32xf32>, vector<8x32xf32> -> vector<8x32xf32>
    %c0_9 = arith.constant 0 : index
    %c0_10 = arith.constant 0 : index
    %10 = vector.load %arg5[%c0_9, %c0_10] : memref<1x32xf32, #tpu.memory_space<vmem>>, vector<1x32xf32>
    %11 = vector.broadcast %10 : vector<1x32xf32> to vector<8x32xf32>
    %12 = arith.addf %9, %11 : vector<8x32xf32>
    %cst_11 = arith.constant 0.000000e+00 : f32
    %13 = vector.broadcast %cst_11 : f32 to vector<8x32xf32>
    %14 = arith.maximumf %12, %13 : vector<8x32xf32>
    %c0_12 = arith.constant 0 : index
    %c0_13 = arith.constant 0 : index
    %15 = vector.load %arg6[%c0_12, %c0_13] : memref<32x32xf32, #tpu.memory_space<vmem>>, vector<32x32xf32>
    %cst_14 = arith.constant dense<0.000000e+00> : vector<8x32xf32>
    %16 = tpu.matmul %14, %15, %cst_14 {dimension_numbers = #tpu.dot_dimension_numbers<[1], [0], [0], [1], [0, 0, 1, 1], [], []>} : vector<8x32xf32>, vector<32x32xf32>, vector<8x32xf32> -> vector<8x32xf32>
    %c0_15 = arith.constant 0 : index
    %c0_16 = arith.constant 0 : index
    %17 = vector.load %arg7[%c0_15, %c0_16] : memref<1x32xf32, #tpu.memory_space<vmem>>, vector<1x32xf32>
    %18 = vector.broadcast %17 : vector<1x32xf32> to vector<8x32xf32>
    %19 = arith.addf %16, %18 : vector<8x32xf32>
    %cst_17 = arith.constant 0.000000e+00 : f32
    %20 = vector.broadcast %cst_17 : f32 to vector<8x32xf32>
    %21 = arith.maximumf %19, %20 : vector<8x32xf32>
    %c0_18 = arith.constant 0 : index
    %c0_19 = arith.constant 0 : index
    %22 = vector.load %arg8[%c0_18, %c0_19] : memref<32x16xf32, #tpu.memory_space<vmem>>, vector<32x16xf32>
    %cst_20 = arith.constant dense<0.000000e+00> : vector<8x16xf32>
    %23 = tpu.matmul %21, %22, %cst_20 {dimension_numbers = #tpu.dot_dimension_numbers<[1], [0], [0], [1], [0, 0, 1, 1], [], []>} : vector<8x32xf32>, vector<32x16xf32>, vector<8x16xf32> -> vector<8x16xf32>
    %c0_21 = arith.constant 0 : index
    %c0_22 = arith.constant 0 : index
    %24 = vector.load %arg9[%c0_21, %c0_22] : memref<1x16xf32, #tpu.memory_space<vmem>>, vector<1x16xf32>
    %25 = vector.broadcast %24 : vector<1x16xf32> to vector<8x16xf32>
    %26 = arith.addf %23, %25 : vector<8x16xf32>
    %27 = vector.extract_strided_slice %26 {offsets = [0, 0], sizes = [8, 8], strides = [1, 1]} : vector<8x16xf32> to vector<8x8xf32>
    %c0_23 = arith.constant 0 : index
    %c0_24 = arith.constant 0 : index
    %28 = vector.load %arg10[%c0_23, %c0_24] : memref<8x8xf32, #tpu.memory_space<vmem>>, vector<8x8xf32>
    tpu.vector_store %arg10[%c0_23, %c0_24], %27 {strides = array<i32>} : memref<8x8xf32, #tpu.memory_space<vmem>>, vector<8x8xf32>,
    %29 = vector.extract_strided_slice %26 {offsets = [0, 8], sizes = [8, 8], strides = [1, 1]} : vector<8x16xf32> to vector<8x8xf32>
    %cst_25 = arith.constant -2.000000e+01 : f32
    %cst_26 = arith.constant 2.000000e+00 : f32
    %30 = vector.broadcast %cst_25 : f32 to vector<8x8xf32>
    %31 = arith.maximumf %30, %29 : vector<8x8xf32>
    %32 = vector.broadcast %cst_26 : f32 to vector<8x8xf32>
    %33 = arith.minimumf %32, %31 : vector<8x8xf32>
    %c0_27 = arith.constant 0 : index
    %c0_28 = arith.constant 0 : index
    %34 = vector.load %arg11[%c0_27, %c0_28] : memref<8x8xf32, #tpu.memory_space<vmem>>, vector<8x8xf32>
    tpu.vector_store %arg11[%c0_27, %c0_28], %33 {strides = array<i32>} : memref<8x8xf32, #tpu.memory_space<vmem>>, vector<8x8xf32>,
    return
  }
  func.func @transform_0(%arg0: i32) -> (i32, i32) {
    %c0_i32 = arith.constant 0 : i32
    %c0_i32_0 = arith.constant 0 : i32
    return %arg0, %c0_i32 : i32, i32
  }
  func.func @transform_1(%arg0: i32) -> (i32, i32) {
    %c0_i32 = arith.constant 0 : i32
    %c0_i32_0 = arith.constant 0 : i32
    %c0_i32_1 = arith.constant 0 : i32
    return %c0_i32, %c0_i32_0 : i32, i32
  }
  func.func @transform_2(%arg0: i32) -> (i32, i32) {
    %c0_i32 = arith.constant 0 : i32
    %c0_i32_0 = arith.constant 0 : i32
    %c0_i32_1 = arith.constant 0 : i32
    return %c0_i32, %c0_i32_0 : i32, i32
  }
  func.func @transform_3(%arg0: i32) -> (i32, i32) {
    %c0_i32 = arith.constant 0 : i32
    %c0_i32_0 = arith.constant 0 : i32
    %c0_i32_1 = arith.constant 0 : i32
    return %c0_i32, %c0_i32_0 : i32, i32
  }
  func.func @transform_4(%arg0: i32) -> (i32, i32) {
    %c0_i32 = arith.constant 0 : i32
    %c0_i32_0 = arith.constant 0 : i32
    %c0_i32_1 = arith.constant 0 : i32
    return %c0_i32, %c0_i32_0 : i32, i32
  }
  func.func @transform_5(%arg0: i32) -> (i32, i32) {
    %c0_i32 = arith.constant 0 : i32
    %c0_i32_0 = arith.constant 0 : i32
    %c0_i32_1 = arith.constant 0 : i32
    return %c0_i32, %c0_i32_0 : i32, i32
  }
  func.func @transform_6(%arg0: i32) -> (i32, i32) {
    %c0_i32 = arith.constant 0 : i32
    %c0_i32_0 = arith.constant 0 : i32
    %c0_i32_1 = arith.constant 0 : i32
    return %c0_i32, %c0_i32_0 : i32, i32
  }
  func.func @transform_7(%arg0: i32) -> (i32, i32) {
    %c0_i32 = arith.constant 0 : i32
    %c0_i32_0 = arith.constant 0 : i32
    %c0_i32_1 = arith.constant 0 : i32
    return %c0_i32, %c0_i32_0 : i32, i32
  }
  func.func @transform_8(%arg0: i32) -> (i32, i32) {
    %c0_i32 = arith.constant 0 : i32
    %c0_i32_0 = arith.constant 0 : i32
    %c0_i32_1 = arith.constant 0 : i32
    return %c0_i32, %c0_i32_0 : i32, i32
  }
  func.func @transform_9(%arg0: i32) -> (i32, i32) {
    %c0_i32 = arith.constant 0 : i32
    %c0_i32_0 = arith.constant 0 : i32
    return %arg0, %c0_i32 : i32, i32
  }
  func.func @transform_10(%arg0: i32) -> (i32, i32) {
    %c0_i32 = arith.constant 0 : i32
    %c0_i32_0 = arith.constant 0 : i32
    return %arg0, %c0_i32 : i32, i32
  }
}

</mosaic_0001>

<bundles_post_ra>
// kernel: actor_cql_forward.1
= control target key start
LH: loop header
LB: loop body
LE: loop exit
PB: predicated region body
PF: predicated region fallthrough
CT: control target
= control target key end

     0   :  { %16 = vsyncpa [#allocation3], 0  ;;  %s477_s0 = inlined_call_operand.hbm [shape: f32[8,16], index: 0, kind: input, shape index: {}]   ;;  %s478_s1 = inlined_call_operand.vmem [shape: f32[16,32], index: 1, kind: input, shape index: {}]   ;;  %s479_s2 = inlined_call_operand.vmem [shape: f32[1,32], index: 2, kind: input, shape index: {}]   ;;  %s480_s3 = inlined_call_operand.vmem [shape: f32[32,32], index: 3, kind: input, shape index: {}]   ;;  %s481_s4 = inlined_call_operand.vmem [shape: f32[1,32], index: 4, kind: input, shape index: {}]   ;;  %s482_s5 = inlined_call_operand.hbm [shape: f32[32,32], index: 5, kind: input, shape index: {}]   ;;  %s483_s6 = inlined_call_operand.vmem [shape: f32[1,32], index: 6, kind: input, shape index: {}]   ;;  %s484_s7 = inlined_call_operand.vmem [shape: f32[32,16], index: 7, kind: input, shape index: {}]   ;;  %s485_s8 = inlined_call_operand.vmem [shape: f32[1,16], index: 8, kind: input, shape index: {}]   ;;  %s486_s9 = inlined_call_operand.hbm [shape: f32[8,8], index: 9, kind: output, shape index: {0}]   ;;  %s487_s10 = inlined_call_operand.hbm [shape: f32[8,8], index: 10, kind: output, shape index: {1}]  }
   0x1   :  { %17 = vsyncpa [#allocation6], 0 }
   0x2   :  { %18 = vsyncpa [#allocation4], 0 }
   0x3   :  { %19 = vsyncpa [#allocation9], 0  ;;  %s25_s15 = sshll.u32 %s477_s0, 4  ;;  %s356_s16 = smov [#allocation2]   ;;  %s26_s15 = int_to_ptr.hbm [resolvable:$true] %s25_s15 }
   0x4   :  { %s27_s17 = sshll.u32 %s356_s16, 4  ;;  %s43_s20 = sshll.u32 %s482_s5, 4  ;;  %s28_s17 = int_to_ptr.vmem [resolvable:$true] %s27_s17  ;;  %s44_s20 = int_to_ptr.hbm [resolvable:$true] %s43_s20 }
   0x5   :  { %30 = dma.hbm_to_vmem [thread:$0]  %s26_s15, 128, %s28_s17, [#allocation3]  }
   0x6   :  { %s357_s21 = smov [#allocation5]   ;;  %s358_s23 = smov 128  }
   0x7   :  { %s45_s22 = sshll.u32 %s357_s21, 4  ;;  %s359_s24 = smov 8   ;;  %s46_s22 = int_to_ptr.vmem [resolvable:$true] %s45_s22 }
   0x8   :  { %51 = dma.hbm_to_vmem [thread:$0]  %s44_s20, 512, %s46_s22, [#allocation6], %s358_s23, %s358_s23, %s359_s24  }
   0x9   :  { %348 = dma.done.wait [#allocation3], 128  }
   0xa   :  { %349 = vsyncadd [#allocation3], 4294967168 }
   0xb   :  { %350 = dma.done.wait [#allocation6], 512  }
   0xc   :  { %351 = vsyncadd [#allocation6], 4294966784  ;;  %v68_v0 = vld [vmem:[%s478_s1 + $0x8] sm:$0xff]  ;;  %v67_v1 = vld [vmem:[%s478_s1] sm:$0xff]  ;;  %vm73_vm0 = vcmask 130048   ;;  %vm106_vm1 = vcmask 261120  }
   0xd   :  { %91 = vmatpush.msra.mxu0 %v68_v0  ;;  %v66_v2 = vld [vmem:[#allocation2] sm:$0xff]  ;;  %v101_v3 = vld [vmem:[%s480_s3 + $0x18] sm:$0xff]  ;;  %v100_v4 = vld [vmem:[%s480_s3 + $0x10] sm:$0xff]  ;;  %s360_s26 = smov [#allocation7]   ;;  %vm194_vm2 = vcmask 64512   ;;  %s362_s29 = smov [#allocation8]  }
   0xe   :  { %122 = vmatpush.msra.mxu1 %v101_v3  ;;  %v99_v5 = vld [vmem:[%s480_s3 + $0x8] sm:$0xff]  ;;  %v98_v6 = vld [vmem:[%s480_s3] sm:$0xff]  ;;  %v133_v12 = vld [vmem:[#allocation5 + $0x10] sm:$0xff]  ;;  %s208_s27 = sshll.u32 %s360_s26, 4  ;;  %s221_s12 = sshll.u32 %s487_s10, 4  ;;  %s209_s27 = int_to_ptr.vmem [resolvable:$true] %s208_s27  ;;  %s222_s12 = int_to_ptr.hbm [resolvable:$true] %s221_s12 }
   0xf   :  { %92 = vmatpush.msra.mxu0 %v67_v1  ;;  %v134_v7 = vld [vmem:[#allocation5 + $0x18] sm:$0xff]  ;;  %v132_v13 = vld [vmem:[#allocation5 + $0x8] sm:$0xff]  ;;  %v131_v14 = vld [vmem:[#allocation5] sm:$0xff] }
  0x10   :  { %237 = vmatmul.msk.f32.vlgmr.msra.gmra.mxu0 %vm73_vm0, %v66_v2  ;;  %123 = vmatpush.msra.mxu1 %v100_v4  ;;  %v248_v8 = vld [vmem:[%s479_s2] ss:$0 sm:$0xff]  ;;  %v166_v15 = vld [vmem:[%s484_s7 + $0x18] sm:$0xff]  ;;  %v165_v20 = vld [vmem:[%s484_s7 + $0x10] sm:$0xff] }
  0x11   :  { %154 = vmatpush.msra.mxu2 %v134_v7  ;;  %186 = vmatpush.msra.mxu3 %v166_v15  ;;  %v249_v16 = vld [vmem:[%s481_s4] ss:$0 sm:$0xff]  ;;  %v164_v21 = vld [vmem:[%s484_s7 + $0x8] sm:$0xff] }
  0x12   :  { %124 = vmatpush.msra.mxu1 %v99_v5  ;;  %v163_v22 = vld [vmem:[%s484_s7] sm:$0xff]  ;;  %s210_s7 = sshll.u32 %s486_s9, 4  ;;  %s211_s7 = int_to_ptr.hbm [resolvable:$true] %s210_s7 }
  0x13   :  { %155 = vmatpush.msra.mxu2 %v133_v12  ;;  %187 = vmatpush.msra.mxu3 %v165_v20  ;;  %v250_v23 = vld [vmem:[%s483_s6] ss:$0 sm:$0xff]  ;;  %s361_s6 = smov 120  }
  0x14   :  { %125 = vmatpush.msra.mxu1 %v98_v6  ;;  %v251_v27 = vld [vmem:[%s485_s8] ss:$0 sm:$0xff]  ;;  %s219_s8 = sshll.u32 %s362_s29, 4  ;;  %s220_s8 = int_to_ptr.vmem [resolvable:$true] %s219_s8 }
  0x15   :  { %156 = vmatpush.msra.mxu2 %v132_v13  ;;  %188 = vmatpush.msra.mxu3 %v164_v21 }
  0x17   :  { %157 = vmatpush.msra.mxu2 %v131_v14  ;;  %189 = vmatpush.msra.mxu3 %v163_v22 }
  0x8d   :  { %v94_v9 = vpop.f32.mrf.mxu0 }
  0x8e   :  { %v95_v10 = vadd.f32 %v248_v8, %v94_v9 }
  0x90   :  { %v97_v11 = vmax.f32 %v95_v10, 0.0 }
  0x92   :  { %238 = vmatmul.msk.f32.vlgmr.msra.gmra.mxu1 %vm106_vm1, %v97_v11 }
 0x10f   :  { %v127_v17 = vpop.f32.mrf.mxu1 }
 0x110   :  { %v128_v18 = vadd.f32 %v249_v16, %v127_v17 }
 0x112   :  { %v130_v19 = vmax.f32 %v128_v18, 0.0 }
 0x114   :  { %239 = vmatmul.msk.f32.vlgmr.msra.gmra.mxu2 %vm106_vm1, %v130_v19 }
 0x197   :  { %v159_v24 = vpop.f32.mrf.mxu2 }
 0x198   :  { %v160_v25 = vadd.f32 %v250_v23, %v159_v24 }
 0x19a   :  { %v162_v26 = vmax.f32 %v160_v25, 0.0 }
 0x19c   :  { %240 = vmatmul.msk.f32.vlgmr.msra.gmra.mxu3 %vm106_vm1, %v162_v26 }
 0x21f   :  { %v191_v28 = vpop.f32.mrf.mxu3 }
 0x220   :  { %v192_v29 = vadd.f32 %v251_v27, %v191_v28 }
 0x222   :  { %v196_v30 = vmax.f32 %v192_v29, -20.0  ;;  %195 = vst.msk [vmem:[#allocation7] sm:$0xff] %vm194_vm2, %v192_v29 }
 0x223   :  { %213 = dma.vmem_to_hbm [thread:$0]  %s209_s27, 128, %s211_s7, [#allocation4]  }
 0x224   :  { %v197_v31 = vmin.f32 %v196_v30, 2.0 }
 0x226   :  { %199 = vrot.lane.b32.xlu0 %v197_v31, %s361_s6 }
 0x298   :  { %v200_v32 = vpop.permute.xlu0 %199 }
 0x299   :  { %202 = vst.msk [vmem:[#allocation8] sm:$0xff] %vm194_vm2, %v200_v32 }
 0x29a   :  { %224 = dma.vmem_to_hbm [thread:$0]  %s220_s8, 128, %s222_s12, [#allocation9]  }
 0x29b   :  { %352 = dma.done.wait [#allocation4], 128  }
 0x29c   :  { %353 = vsyncadd [#allocation4], 4294967168 }
 0x29d   :  { %354 = dma.done.wait [#allocation9], 128  }
 0x29e   :  { %355 = vsyncadd [#allocation9], 4294967168 }
 0x29f   :  { %233 = vsyncpa [#allocation3], 1 }
 0x2a0   :  { %234 = vsyncpa [#allocation6], 1 }
 0x2a1   :  { %235 = vsyncpa [#allocation4], 1 }
 0x2a2   :  { %236 = vsyncpa [#allocation9], 1 }

</bundles_post_ra>
